<compile_context>
chip_gen: v7x
topology: tpu7x:2x2x1
jax: 0.10.0
libtpu: 0.0.40
codegen_flags: <defaults>
</compile_context>

<pallas_src>
import jax
import jax.numpy as jnp
from jax.experimental import pallas as pl
from jax.experimental.pallas import tpu as pltpu


def supervised_graphsage_kernel(nodes_ref,     # SMEM (N,)      int32  (scalar prefetch)
                                feat_ref,      # VMEM (T, F)    f32    all node features
                                adj_ref,       # VMEM (TN, T)   f32    row-normalized neighbor weights
                                wself_ref,     # VMEM (F, D)    f32    encoder weight, self half (pre-T)
                                wneigh_ref,    # VMEM (F, D)    f32    encoder weight, neighbor half (pre-T)
                                wcls_ref,      # VMEM (D, CP)   f32    classifier weight.T, zero-padded to CP
                                out_ref,       # VMEM (TN, CP)  f32    scores.t() (padded classes)
                                self_scratch): # VMEM (TN, F)   f32    gathered self features
    tn = self_scratch.shape[0]
    base = pl.program_id(0) * tn

    # --- self feature gather: self_scratch[j] = features[nodes[base + j]] ---
    # nodes live in SMEM (scalar prefetch); each read drives a dynamic
    # single-row slice of the VMEM-resident feature tile.
    for j in range(tn):                              # small static unroll
        idx = nodes_ref[base + j]
        self_scratch[pl.ds(j, 1), :] = feat_ref[pl.ds(idx, 1), :]

    feats = feat_ref[...]                            # (T, F)
    self_feats = self_scratch[...]                   # (TN, F)

    # --- mean-aggregated neighbor features (MXU) ---
    neigh_feats = jnp.dot(adj_ref[...], feats,
                          preferred_element_type=jnp.float32)        # (TN, F)

    # --- encoder: hidden = relu(self @ W_self + neigh @ W_neigh) ---
    # (equivalent to relu(W_enc @ concat(self, neigh).T).T, without the concat)
    hidden = jnp.dot(self_feats, wself_ref[...],
                     preferred_element_type=jnp.float32)              # (TN, D)
    hidden = hidden + jnp.dot(neigh_feats, wneigh_ref[...],
                              preferred_element_type=jnp.float32)
    hidden = jnp.maximum(hidden, 0.0)                                  # relu in f32

    # --- classifier, lane-dense padded class dim ---
    out_ref[...] = jnp.dot(hidden, wcls_ref[...],
                           preferred_element_type=jnp.float32).astype(out_ref.dtype)


def supervised_graphsage_forward(nodes, features, adj_norm, w_enc, w_cls, *, tile_n=8):
    """Fused GraphSAGE encoder + classifier; returns scores.t() of shape (N, C)."""
    T, F = features.shape
    N = nodes.shape[0]
    D = w_enc.shape[0]
    C = w_cls.shape[0]
    assert w_enc.shape == (D, 2 * F)
    assert adj_norm.shape == (N, T)
    assert w_cls.shape == (C, D)
    assert N % tile_n == 0, "demo wrapper assumes N divisible by the batch tile"

    CP = 128  # lane-dense padded class dimension

    # Pre-split / pre-transpose weights once (free in the wrapper, avoids
    # in-kernel XLU transposes and the concat temporary).
    w_self = jnp.asarray(w_enc[:, :F].T, jnp.float32)      # (F, D)
    w_neigh = jnp.asarray(w_enc[:, F:].T, jnp.float32)     # (F, D)
    w_cls_t = jnp.zeros((D, CP), jnp.float32).at[:, :C].set(w_cls.T)

    nodes_i32 = nodes.astype(jnp.int32)

    cost = pl.CostEstimate(
        flops=2 * N * T * F + 4 * N * F * D + 2 * N * D * CP,
        transcendentals=0,
        bytes_accessed=4 * (T * F + N * T + 2 * F * D + D * CP + N * CP + N),
    )

    out_padded = pl.pallas_call(
        supervised_graphsage_kernel,
        out_shape=jax.ShapeDtypeStruct((N, CP), jnp.float32),
        grid_spec=pltpu.PrefetchScalarGridSpec(
            num_scalar_prefetch=1,
            grid=(N // tile_n,),
            in_specs=[
                pl.BlockSpec((T, F), lambda i, nref: (0, 0)),          # features (resident)
                pl.BlockSpec((tile_n, T), lambda i, nref: (i, 0)),     # adj rows for this batch tile
                pl.BlockSpec((F, D), lambda i, nref: (0, 0)),          # W_self
                pl.BlockSpec((F, D), lambda i, nref: (0, 0)),          # W_neigh
                pl.BlockSpec((D, CP), lambda i, nref: (0, 0)),         # W_cls.T (padded)
            ],
            out_specs=pl.BlockSpec((tile_n, CP), lambda i, nref: (i, 0)),
            scratch_shapes=[pltpu.VMEM((tile_n, F), jnp.float32)],
        ),
        compiler_params=pltpu.CompilerParams(
            dimension_semantics=("parallel",)),
        cost_estimate=cost,
    )(nodes_i32, features, adj_norm, w_self, w_neigh, w_cls_t)

    return out_padded[:, :C]


def xavier_uniform(key, shape):
    fan_out, fan_in = shape
    bound = jnp.sqrt(6.0 / (fan_in + fan_out))
    return jax.random.uniform(key, shape, jnp.float32, -bound, bound)


if __name__ == "__main__":
    # Small, tile-friendly shapes.
    T = 64          # total nodes in the graph
    F = 128         # raw feature dim
    N = 32          # batch of query nodes
    D = 128         # enc.embed_dim
    C = 8           # num_classes

    key = jax.random.PRNGKey(0)
    k_feat, k_adj, k_nodes, k_wenc, k_wcls = jax.random.split(key, 5)

    features = jax.random.normal(k_feat, (T, F), jnp.float32)

    # random neighborhood structure -> mean-aggregation matrix (row-normalized)
    adj_mask = (jax.random.uniform(k_adj, (N, T)) < 0.2).astype(jnp.float32)
    adj_mask = adj_mask.at[:, 0].set(1.0)          # guarantee >= 1 neighbor
    adj_norm = adj_mask / jnp.sum(adj_mask, axis=1, keepdims=True)

    # query node ids
    nodes = jax.random.randint(k_nodes, (N,), 0, T, dtype=jnp.int32)

    # deterministic parameter init (xavier_uniform, matching the module)
    w_enc = xavier_uniform(k_wenc, (D, 2 * F))     # encoder weight (D, 2F)
    w_cls = xavier_uniform(k_wcls, (C, D))         # SupervisedGraphSage.weight

    out = supervised_graphsage_forward(nodes, features, adj_norm, w_enc, w_cls,
                                       tile_n=8)
    out = jax.block_until_ready(out)

    # plain-JAX reference of the module's forward pass
    self_f = features[nodes]                               # enc self gather
    neigh_f = adj_norm @ features                          # mean aggregator
    combined = jnp.concatenate([self_f, neigh_f], axis=1)  # (N, 2F)
    embeds = jnp.maximum(w_enc @ combined.T, 0.0)          # (D, N)
    ref = (w_cls @ embeds).T                               # scores.t() -> (N, C)

    assert out.shape == (N, C)
    assert jnp.allclose(out, ref, atol=1e-4, rtol=1e-4), \
        float(jnp.max(jnp.abs(out - ref)))
    print("KERNEL_OK")
</pallas_src>

<mosaic_0001>
module attributes {stable_mosaic.version = 11 : i64} {
  func.func @supervised_graphsage_kernel(%arg0: i32, %arg1: memref<32xi32, #tpu.memory_space<smem>>, %arg2: memref<64x128xf32, #tpu.memory_space<vmem>>, %arg3: memref<8x64xf32, #tpu.memory_space<vmem>>, %arg4: memref<128x128xf32, #tpu.memory_space<vmem>>, %arg5: memref<128x128xf32, #tpu.memory_space<vmem>>, %arg6: memref<128x128xf32, #tpu.memory_space<vmem>>, %arg7: memref<8x128xf32, #tpu.memory_space<vmem>>, %arg8: memref<8x128xf32, #tpu.memory_space<vmem>>) attributes {dimension_semantics = [#tpu.dimension_semantics<parallel>], iteration_bounds = array<i64: 4>, scalar_prefetch = 1 : i64, scratch_operands = 1 : i64, tpu.core_type = #tpu.core_type<tc>, window_params = [{pipeline_mode = #tpu.pipeline_mode<synchronous>, transform_indices = @transform_0, window_bounds = array<i64: 64, 128>}, {transform_indices = @transform_1, window_bounds = array<i64: 8, 64>}, {pipeline_mode = #tpu.pipeline_mode<synchronous>, transform_indices = @transform_2, window_bounds = array<i64: 128, 128>}, {pipeline_mode = #tpu.pipeline_mode<synchronous>, transform_indices = @transform_3, window_bounds = array<i64: 128, 128>}, {pipeline_mode = #tpu.pipeline_mode<synchronous>, transform_indices = @transform_4, window_bounds = array<i64: 128, 128>}, {transform_indices = @transform_5, window_bounds = array<i64: 8, 128>}]} {
    %c8_i32 = arith.constant 8 : i32
    %0 = arith.muli %arg0, %c8_i32 : i32
    %c0_i32 = arith.constant 0 : i32
    %1 = arith.addi %0, %c0_i32 : i32
    %2 = arith.index_cast %1 : i32 to index
    %3 = memref.load %arg1[%2] : memref<32xi32, #tpu.memory_space<smem>>
    %4 = arith.index_cast %3 : i32 to index
    %c0 = arith.constant 0 : index
    %5 = vector.load %arg2[%4, %c0] : memref<64x128xf32, #tpu.memory_space<vmem>>, vector<1x128xf32>
    %c0_0 = arith.constant 0 : index
    %c0_1 = arith.constant 0 : index
    %6 = vector.load %arg8[%c0_0, %c0_1] : memref<8x128xf32, #tpu.memory_space<vmem>>, vector<1x128xf32>
    tpu.vector_store %arg8[%c0_0, %c0_1], %5 {strides = array<i32>} : memref<8x128xf32, #tpu.memory_space<vmem>>, vector<1x128xf32>,
    %c1_i32 = arith.constant 1 : i32
    %7 = arith.addi %0, %c1_i32 : i32
    %8 = arith.index_cast %7 : i32 to index
    %9 = memref.load %arg1[%8] : memref<32xi32, #tpu.memory_space<smem>>
    %10 = arith.index_cast %9 : i32 to index
    %c0_2 = arith.constant 0 : index
    %11 = vector.load %arg2[%10, %c0_2] : memref<64x128xf32, #tpu.memory_space<vmem>>, vector<1x128xf32>
    %c1 = arith.constant 1 : index
    %c0_3 = arith.constant 0 : index
    %12 = vector.load %arg8[%c1, %c0_3] : memref<8x128xf32, #tpu.memory_space<vmem>>, vector<1x128xf32>
    tpu.vector_store %arg8[%c1, %c0_3], %11 {strides = array<i32>} : memref<8x128xf32, #tpu.memory_space<vmem>>, vector<1x128xf32>,
    %c2_i32 = arith.constant 2 : i32
    %13 = arith.addi %0, %c2_i32 : i32
    %14 = arith.index_cast %13 : i32 to index
    %15 = memref.load %arg1[%14] : memref<32xi32, #tpu.memory_space<smem>>
    %16 = arith.index_cast %15 : i32 to index
    %c0_4 = arith.constant 0 : index
    %17 = vector.load %arg2[%16, %c0_4] : memref<64x128xf32, #tpu.memory_space<vmem>>, vector<1x128xf32>
    %c2 = arith.constant 2 : index
    %c0_5 = arith.constant 0 : index
    %18 = vector.load %arg8[%c2, %c0_5] : memref<8x128xf32, #tpu.memory_space<vmem>>, vector<1x128xf32>
    tpu.vector_store %arg8[%c2, %c0_5], %17 {strides = array<i32>} : memref<8x128xf32, #tpu.memory_space<vmem>>, vector<1x128xf32>,
    %c3_i32 = arith.constant 3 : i32
    %19 = arith.addi %0, %c3_i32 : i32
    %20 = arith.index_cast %19 : i32 to index
    %21 = memref.load %arg1[%20] : memref<32xi32, #tpu.memory_space<smem>>
    %22 = arith.index_cast %21 : i32 to index
    %c0_6 = arith.constant 0 : index
    %23 = vector.load %arg2[%22, %c0_6] : memref<64x128xf32, #tpu.memory_space<vmem>>, vector<1x128xf32>
    %c3 = arith.constant 3 : index
    %c0_7 = arith.constant 0 : index
    %24 = vector.load %arg8[%c3, %c0_7] : memref<8x128xf32, #tpu.memory_space<vmem>>, vector<1x128xf32>
    tpu.vector_store %arg8[%c3, %c0_7], %23 {strides = array<i32>} : memref<8x128xf32, #tpu.memory_space<vmem>>, vector<1x128xf32>,
    %c4_i32 = arith.constant 4 : i32
    %25 = arith.addi %0, %c4_i32 : i32
    %26 = arith.index_cast %25 : i32 to index
    %27 = memref.load %arg1[%26] : memref<32xi32, #tpu.memory_space<smem>>
    %28 = arith.index_cast %27 : i32 to index
    %c0_8 = arith.constant 0 : index
    %29 = vector.load %arg2[%28, %c0_8] : memref<64x128xf32, #tpu.memory_space<vmem>>, vector<1x128xf32>
    %c4 = arith.constant 4 : index
    %c0_9 = arith.constant 0 : index
    %30 = vector.load %arg8[%c4, %c0_9] : memref<8x128xf32, #tpu.memory_space<vmem>>, vector<1x128xf32>
    tpu.vector_store %arg8[%c4, %c0_9], %29 {strides = array<i32>} : memref<8x128xf32, #tpu.memory_space<vmem>>, vector<1x128xf32>,
    %c5_i32 = arith.constant 5 : i32
    %31 = arith.addi %0, %c5_i32 : i32
    %32 = arith.index_cast %31 : i32 to index
    %33 = memref.load %arg1[%32] : memref<32xi32, #tpu.memory_space<smem>>
    %34 = arith.index_cast %33 : i32 to index
    %c0_10 = arith.constant 0 : index
    %35 = vector.load %arg2[%34, %c0_10] : memref<64x128xf32, #tpu.memory_space<vmem>>, vector<1x128xf32>
    %c5 = arith.constant 5 : index
    %c0_11 = arith.constant 0 : index
    %36 = vector.load %arg8[%c5, %c0_11] : memref<8x128xf32, #tpu.memory_space<vmem>>, vector<1x128xf32>
    tpu.vector_store %arg8[%c5, %c0_11], %35 {strides = array<i32>} : memref<8x128xf32, #tpu.memory_space<vmem>>, vector<1x128xf32>,
    %c6_i32 = arith.constant 6 : i32
    %37 = arith.addi %0, %c6_i32 : i32
    %38 = arith.index_cast %37 : i32 to index
    %39 = memref.load %arg1[%38] : memref<32xi32, #tpu.memory_space<smem>>
    %40 = arith.index_cast %39 : i32 to index
    %c0_12 = arith.constant 0 : index
    %41 = vector.load %arg2[%40, %c0_12] : memref<64x128xf32, #tpu.memory_space<vmem>>, vector<1x128xf32>
    %c6 = arith.constant 6 : index
    %c0_13 = arith.constant 0 : index
    %42 = vector.load %arg8[%c6, %c0_13] : memref<8x128xf32, #tpu.memory_space<vmem>>, vector<1x128xf32>
    tpu.vector_store %arg8[%c6, %c0_13], %41 {strides = array<i32>} : memref<8x128xf32, #tpu.memory_space<vmem>>, vector<1x128xf32>,
    %c7_i32 = arith.constant 7 : i32
    %43 = arith.addi %0, %c7_i32 : i32
    %44 = arith.index_cast %43 : i32 to index
    %45 = memref.load %arg1[%44] : memref<32xi32, #tpu.memory_space<smem>>
    %46 = arith.index_cast %45 : i32 to index
    %c0_14 = arith.constant 0 : index
    %47 = vector.load %arg2[%46, %c0_14] : memref<64x128xf32, #tpu.memory_space<vmem>>, vector<1x128xf32>
    %c7 = arith.constant 7 : index
    %c0_15 = arith.constant 0 : index
    %48 = vector.load %arg8[%c7, %c0_15] : memref<8x128xf32, #tpu.memory_space<vmem>>, vector<1x128xf32>
    tpu.vector_store %arg8[%c7, %c0_15], %47 {strides = array<i32>} : memref<8x128xf32, #tpu.memory_space<vmem>>, vector<1x128xf32>,
    %c0_16 = arith.constant 0 : index
    %c0_17 = arith.constant 0 : index
    %49 = vector.load %arg2[%c0_16, %c0_17] : memref<64x128xf32, #tpu.memory_space<vmem>>, vector<64x128xf32>
    %c0_18 = arith.constant 0 : index
    %c0_19 = arith.constant 0 : index
    %50 = vector.load %arg8[%c0_18, %c0_19] : memref<8x128xf32, #tpu.memory_space<vmem>>, vector<8x128xf32>
    %c0_20 = arith.constant 0 : index
    %c0_21 = arith.constant 0 : index
    %51 = vector.load %arg3[%c0_20, %c0_21] : memref<8x64xf32, #tpu.memory_space<vmem>>, vector<8x64xf32>
    %cst = arith.constant dense<0.000000e+00> : vector<8x128xf32>
    %52 = tpu.matmul %51, %49, %cst {dimension_numbers = #tpu.dot_dimension_numbers<[1], [0], [0], [1], [0, 0, 1, 1], [], []>} : vector<8x64xf32>, vector<64x128xf32>, vector<8x128xf32> -> vector<8x128xf32>
    %c0_22 = arith.constant 0 : index
    %c0_23 = arith.constant 0 : index
    %53 = vector.load %arg4[%c0_22, %c0_23] : memref<128x128xf32, #tpu.memory_space<vmem>>, vector<128x128xf32>
    %cst_24 = arith.constant dense<0.000000e+00> : vector<8x128xf32>
    %54 = tpu.matmul %50, %53, %cst_24 {dimension_numbers = #tpu.dot_dimension_numbers<[1], [0], [0], [1], [0, 0, 1, 1], [], []>} : vector<8x128xf32>, vector<128x128xf32>, vector<8x128xf32> -> vector<8x128xf32>
    %c0_25 = arith.constant 0 : index
    %c0_26 = arith.constant 0 : index
    %55 = vector.load %arg5[%c0_25, %c0_26] : memref<128x128xf32, #tpu.memory_space<vmem>>, vector<128x128xf32>
    %cst_27 = arith.constant dense<0.000000e+00> : vector<8x128xf32>
    %56 = tpu.matmul %52, %55, %cst_27 {dimension_numbers = #tpu.dot_dimension_numbers<[1], [0], [0], [1], [0, 0, 1, 1], [], []>} : vector<8x128xf32>, vector<128x128xf32>, vector<8x128xf32> -> vector<8x128xf32>
    %57 = arith.addf %54, %56 : vector<8x128xf32>
    %cst_28 = arith.constant 0.000000e+00 : f32
    %58 = vector.broadcast %cst_28 : f32 to vector<8x128xf32>
    %59 = arith.maximumf %57, %58 : vector<8x128xf32>
    %c0_29 = arith.constant 0 : index
    %c0_30 = arith.constant 0 : index
    %60 = vector.load %arg6[%c0_29, %c0_30] : memref<128x128xf32, #tpu.memory_space<vmem>>, vector<128x128xf32>
    %cst_31 = arith.constant dense<0.000000e+00> : vector<8x128xf32>
    %61 = tpu.matmul %59, %60, %cst_31 {dimension_numbers = #tpu.dot_dimension_numbers<[1], [0], [0], [1], [0, 0, 1, 1], [], []>} : vector<8x128xf32>, vector<128x128xf32>, vector<8x128xf32> -> vector<8x128xf32>
    %c0_32 = arith.constant 0 : index
    %c0_33 = arith.constant 0 : index
    %62 = vector.load %arg7[%c0_32, %c0_33] : memref<8x128xf32, #tpu.memory_space<vmem>>, vector<8x128xf32>
    tpu.vector_store %arg7[%c0_32, %c0_33], %61 {strides = array<i32>} : memref<8x128xf32, #tpu.memory_space<vmem>>, vector<8x128xf32>,
    return
  }
  func.func @transform_0(%arg0: i32, %arg1: memref<32xi32, #tpu.memory_space<smem>>) -> (i32, i32) {
    %c0_i32 = arith.constant 0 : i32
    %c0_i32_0 = arith.constant 0 : i32
    %c0_i32_1 = arith.constant 0 : i32
    return %c0_i32, %c0_i32_0 : i32, i32
  }
  func.func @transform_1(%arg0: i32, %arg1: memref<32xi32, #tpu.memory_space<smem>>) -> (i32, i32) {
    %c0_i32 = arith.constant 0 : i32
    %c0_i32_0 = arith.constant 0 : i32
    return %arg0, %c0_i32 : i32, i32
  }
  func.func @transform_2(%arg0: i32, %arg1: memref<32xi32, #tpu.memory_space<smem>>) -> (i32, i32) {
    %c0_i32 = arith.constant 0 : i32
    %c0_i32_0 = arith.constant 0 : i32
    %c0_i32_1 = arith.constant 0 : i32
    return %c0_i32, %c0_i32_0 : i32, i32
  }
  func.func @transform_3(%arg0: i32, %arg1: memref<32xi32, #tpu.memory_space<smem>>) -> (i32, i32) {
    %c0_i32 = arith.constant 0 : i32
    %c0_i32_0 = arith.constant 0 : i32
    %c0_i32_1 = arith.constant 0 : i32
    return %c0_i32, %c0_i32_0 : i32, i32
  }
  func.func @transform_4(%arg0: i32, %arg1: memref<32xi32, #tpu.memory_space<smem>>) -> (i32, i32) {
    %c0_i32 = arith.constant 0 : i32
    %c0_i32_0 = arith.constant 0 : i32
    %c0_i32_1 = arith.constant 0 : i32
    return %c0_i32, %c0_i32_0 : i32, i32
  }
  func.func @transform_5(%arg0: i32, %arg1: memref<32xi32, #tpu.memory_space<smem>>) -> (i32, i32) {
    %c0_i32 = arith.constant 0 : i32
    %c0_i32_0 = arith.constant 0 : i32
    return %arg0, %c0_i32 : i32, i32
  }
}

</mosaic_0001>

<bundles_post_ra>
// kernel: tpu_custom_call.1
= control target key start
LH: loop header
LB: loop body
LE: loop exit
PB: predicated region body
PF: predicated region fallthrough
CT: control target
= control target key end

     0   :  { %s1834_s0 = inlined_call_operand.hbm [shape: s32[32], index: 0, kind: input, shape index: {}]   ;;  %s1835_s1 = inlined_call_operand.hbm [shape: f32[64,128], index: 1, kind: input, shape index: {}]   ;;  %s1836_s2 = inlined_call_operand.hbm [shape: f32[32,64], index: 2, kind: input, shape index: {}]   ;;  %s1837_s3 = inlined_call_operand.hbm [shape: f32[128,128], index: 3, kind: input, shape index: {}]   ;;  %s1838_s4 = inlined_call_operand.hbm [shape: f32[128,128], index: 4, kind: input, shape index: {}]   ;;  %s1839_s5 = inlined_call_operand.hbm [shape: f32[128,128], index: 5, kind: input, shape index: {}]   ;;  %s1840_s6 = inlined_call_operand.hbm [shape: f32[32,128], index: 6, kind: output, shape index: {}]  }
   0x1   :  { %1845 = sst [smem:[#allocation21_spill]] %s1835_s1  ;;  %s1204_s23 = scalar_lea.hbm %s1834_s0, 16 }
   0x2   :  { %1846 = sst [smem:[#allocation22_spill]] %s1836_s2  ;;  %p1205_p0 = scmp.ne.s32.totalorder %s1834_s0, %s1204_s23 }
   0x3   :  { %1847 = sst [smem:[#allocation23_spill]] %s1837_s3  ;;  %p1208_p1 = scmp.lt.u32.totalorder %s1204_s23, %s1834_s0 }
   0x4   :  { %1848 = sst [smem:[#allocation24_spill]] %s1838_s4 }
   0x5   :  { %p1210_p2 = pnand %p1208_p1, %p1205_p0 }
   0x7   :  { %1213 = shalt.err (!%p1210_p2)  }
   0x8   :  { %s1438_s28 = smov [#allocation4]  }
   0x9   :  { %12 = dma.hbm_to_smem %s1834_s0, 16, %s1438_s28, [#allocation3] }
   0xa   :  { %1400 = dma.done.wait [#allocation3], 16 }
   0xb   :  { %1401 = vsyncadd [#allocation3], 4294967280 }
   0xc   :  { %14 = sfence }
   0xd   :  { %15 = vsyncpa [#allocation6], 0 }
   0xe   :  { %16 = vsyncpa [#allocation9], 0 }
   0xf   :  { %18 = vsyncpa [#allocation9 + $0x1], 0 }
  0x10   :  { %19 = vsyncpa [#allocation12], 0 }
  0x11   :  { %20 = vsyncpa [#allocation7], 0 }
  0x12   :  { %22 = vsyncpa [#allocation7 + $0x1], 0  ;;  %s1497_s7 = smov 0   ;;  %s1499_s8 = smov 0  }
  0x13   :  { %s1501_s9 = smov 0   ;;  %s1503_s10 = smov 0  }
  0x14 LB: > { %s1518_s0 = sadd.s32 4294967295, %s1436_s10   ;;  %p820_p3 = scmp.ge.s32.totalorder %s1436_s10, 1  ;;  %s1436_s10 = sphi %s1503_s10, %s1875_s10   ;;  %s1432_s9 = sphi %s1501_s9, %s1874_s9   ;;  %s1428_s8 = sphi %s1499_s8, %s1873_s8   ;;  %s1424_s7 = sphi %s1497_s7, %s1872_s7  }
  0x15   : > { %p1841_p4 = scmp.eq.s32.totalorder %s1518_s0, 0  ;;  %p169_p6 = scmp.lt.s32.totalorder %s1436_s10, 5 }
  0x16   : > { %s1439_s12 = smov [#allocation10]   ;;  %s1440_s14 = smov [#allocation11]  }
  0x17   : > { %p1524_p7 = pnand %p820_p3, %p169_p6  ;;  %s194_s13 = sshll.u32 %s1439_s12, 4  ;;  %s1528_s13 = int_to_ptr.vmem [resolvable:$true] %s194_s13 }
  0x18   : > { %s207_s15 = sshll.u32 %s1440_s14, 4  ;;  %s1441_s17 = smov [#allocation5]   ;;  %s1532_s15 = int_to_ptr.vmem [resolvable:$true] %s207_s15 }
  0x19   : > { %s1849_s11 = scalar_select %p1524_p7, 1, 0 }
  0x1a   : > { %p1131_p8 = pneg %p1524_p7  ;;  %s181_s18 = sshll.u32 %s1441_s17, 4  ;;  %s1540_s18 = int_to_ptr.vmem [resolvable:$true] %s181_s18 }
  0x1b   : > { %s1442_s19 = smov [#allocation13]   ;;  %s1851_s3 = sld [smem:[#allocation23_spill]] }
  0x1c   : > { %p1536_p9 = pnand %p1131_p8, %p1841_p4  ;;  %s1542_s20 = sshll.u32 %s1442_s19, 4  ;;  %s221_s20 = int_to_ptr.vmem [resolvable:$true] %s1542_s20 }
  0x1e   : > { %p1552_p11 = pneg %p1536_p9 }
  0x21   : > { %s1214_s23 = scalar_lea.hbm %s1851_s3, 2048 }
  0x22   : > { %p1215_p10 = scmp.ne.s32.totalorder %s1851_s3, %s1214_s23  ;;  %p1221_p0 = scmp.lt.u32.totalorder %s1214_s23, %s1851_s3 }
  0x24   : > { %p1217_p12 = pnand %p1552_p11, %p1215_p10 }
  0x26   : > { %p1218_p13 = pneg %p1217_p12 }
  0x28   : > { %p1223_p1 = pnand %p1221_p0, %p1218_p13 }
  0x2a   : > { %1226 = shalt.err (!%p1223_p1)
}
  0x2b   : > { %s1227_s29 = scalar_lea.vmem %s1528_s13, 2048  ;;  %p1235_p8 = scmp.lt.s32.totalorder %s1528_s13, %s1528_s13 }
  0x2c   : > { %p1228_p2 = scmp.ne.s32.totalorder %s1528_s13, %s1227_s29  ;;  %p1236_p4 = scmp.lt.s32.totalorder %s1227_s29, %s1227_s29 }
  0x2e   : > { %p1230_p3 = pnand %p1228_p2, %p1552_p11  ;;  %p1237_p10 = por %p1236_p4, %p1235_p8 }
  0x30   : > { %p1231_p6 = pneg %p1230_p3 }
  0x32   : > { %p1238_p12 = pnand %p1237_p10, %p1231_p6 }
  0x34   : > { %1241 = shalt.err (!%p1238_p12)
}
  0x35   : > { %s1443_s30 = smov 128   ;;  %s1444_s12 = smov 8  }
  0x36   : > { %1137 = dma.hbm_to_vmem [thread:$0]  (!%p1536_p9), %s1851_s3, 2048, %s1528_s13, [#allocation9], %s1443_s30, %s1443_s30, %s1444_s12  }
  0x37   : > { %s1853_s4 = sld [smem:[#allocation24_spill]] }
  0x3d   : > { %s1242_s22 = scalar_lea.hbm %s1853_s4, 2048 }
  0x3e   : > { %p1243_p4 = scmp.ne.s32.totalorder %s1853_s4, %s1242_s22  ;;  %p1249_p1 = scmp.lt.u32.totalorder %s1242_s22, %s1853_s4 }
  0x40   : > { %p1245_p13 = pnand %p1243_p4, %p1552_p11 }
  0x42   : > { %p1246_p0 = pneg %p1245_p13 }
  0x44   : > { %p1251_p2 = pnand %p1249_p1, %p1246_p0 }
  0x46   : > { %1254 = shalt.err (!%p1251_p2)
}
  0x47   : > { %s1255_s13 = scalar_lea.vmem %s1532_s15, 2048  ;;  %p1263_p10 = scmp.lt.s32.totalorder %s1532_s15, %s1532_s15 }
  0x48   : > { %p1256_p3 = scmp.ne.s32.totalorder %s1532_s15, %s1255_s13  ;;  %p1264_p12 = scmp.lt.s32.totalorder %s1255_s13, %s1255_s13 }
  0x4a   : > { %p1258_p6 = pnand %p1256_p3, %p1552_p11  ;;  %p1265_p4 = por %p1264_p12, %p1263_p10 }
  0x4c   : > { %p1259_p8 = pneg %p1258_p6 }
  0x4e   : > { %p1266_p13 = pnand %p1265_p4, %p1259_p8 }
  0x50   : > { %1269 = shalt.err (!%p1266_p13)
}
  0x51   : > { %1140 = dma.hbm_to_vmem [thread:$0]  (!%p1536_p9), %s1853_s4, 2048, %s1532_s15, [#allocation12], %s1443_s30, %s1443_s30, %s1444_s12  }
  0x52   : > { %s1854_s1 = sld [smem:[#allocation21_spill]] }
  0x58   : > { %s1270_s19 = scalar_lea.hbm %s1854_s1, 1024 }
  0x59   : > { %p1271_p0 = scmp.ne.s32.totalorder %s1854_s1, %s1270_s19  ;;  %p1277_p3 = scmp.lt.u32.totalorder %s1270_s19, %s1854_s1 }
  0x5b   : > { %p1273_p1 = pnand %p1271_p0, %p1552_p11 }
  0x5d   : > { %p1274_p2 = pneg %p1273_p1 }
  0x5f   : > { %p1279_p6 = pnand %p1277_p3, %p1274_p2 }
  0x61   : > { %1282 = shalt.err (!%p1279_p6)
}
  0x62   : > { %s1283_s15 = scalar_lea.vmem %s1540_s18, 1024  ;;  %p1291_p4 = scmp.lt.s32.totalorder %s1540_s18, %s1540_s18 }
  0x63   : > { %p1284_p8 = scmp.ne.s32.totalorder %s1540_s18, %s1283_s15  ;;  %p1292_p13 = scmp.lt.s32.totalorder %s1283_s15, %s1283_s15 }
  0x65   : > { %p1286_p10 = pnand %p1284_p8, %p1552_p11  ;;  %p1293_p0 = por %p1292_p13, %p1291_p4 }
  0x67   : > { %p1287_p12 = pneg %p1286_p10 }
  0x69   : > { %p1294_p1 = pnand %p1293_p0, %p1287_p12 }
  0x6b   : > { %1297 = shalt.err (!%p1294_p1)
}
  0x6c   : > { %1134 = dma.hbm_to_vmem [thread:$0]  (!%p1536_p9), %s1854_s1, 1024, %s1540_s18, [#allocation6], %s1443_s30, %s1443_s30, %s1444_s12  }
  0x6d   : > { %s1298_s29 = scalar_lea.hbm %s1839_s5, 2048 }
  0x6e   : > { %p1299_p2 = scmp.ne.s32.totalorder %s1839_s5, %s1298_s29  ;;  %p1305_p8 = scmp.lt.u32.totalorder %s1298_s29, %s1839_s5 }
  0x70   : > { %p1301_p3 = pnand %p1299_p2, %p1552_p11 }
  0x72   : > { %p1302_p6 = pneg %p1301_p3 }
  0x74   : > { %p1307_p10 = pnand %p1305_p8, %p1302_p6 }
  0x76   : > { %1310 = shalt.err (!%p1307_p10)
}
  0x77   : > { %s1311_s22 = scalar_lea.vmem %s221_s20, 2048  ;;  %p1319_p0 = scmp.lt.s32.totalorder %s221_s20, %s221_s20 }
  0x78   : > { %p1312_p12 = scmp.ne.s32.totalorder %s221_s20, %s1311_s22  ;;  %p1320_p1 = scmp.lt.s32.totalorder %s1311_s22, %s1311_s22 }
  0x7a   : > { %p1314_p4 = pnand %p1312_p12, %p1552_p11  ;;  %p1321_p5 = por %p1320_p1, %p1319_p0 }
  0x7c   : > { %p1315_p13 = pneg %p1314_p4 }
  0x7e   : > { %p1322_p7 = pnand %p1321_p5, %p1315_p13 }
  0x80   : > { %1325 = shalt.err (!%p1322_p7)
}
  0x81   : > { %1143 = dma.hbm_to_vmem [thread:$0]  (!%p1536_p9), %s1839_s5, 2048, %s221_s20, [#allocation12], %s1443_s30, %s1443_s30, %s1444_s12  }
  0x82   : > { %s819_s16 = sadd.s32 4294967294, %s1436_s10   ;;  %s1652_s26 = sadd.s32 1, %s1436_s10  }
  0x83   : > { %s56_s24 = sadd.s32 1, %s1432_s9  ;;  %s53_s15 = ssub.s32 %s1436_s10, %s1652_s26 }
  0x84   : > { %p63_p5 = scmp.ne.s32.totalorder %s1432_s9, %s1428_s8  ;;  %p54_p7 = scmp.eq.s32.totalorder %s53_s15, 0 }
  0x85   : > { %p64_p11 = scmp.eq.s32.totalorder %s1436_s10, 0  ;;  %p69_p2 = scmp.ne.s32.totalorder %s1428_s8, %s1424_s7 }
  0x86   : > { %p1855_p3 = scmp.eq.s32.totalorder %s1518_s0, 3  ;;  %p1857_p8 = scmp.eq.s32.totalorder %s1518_s0, 0 }
  0x87   : > { %s1669_s27 = scalar_select %p54_p7, %s1432_s9, %s56_s24  }
  0x88   : > { %p1664_p6 = por %p1855_p3, %p63_p5  ;;  %p65_p9 = por %p64_p11, %p63_p5 }
  0x89   : > { %p1673_p10 = por %p1857_p8, %p69_p2  ;;  %p162_p12 = scmp.eq.s32.totalorder %s819_s16, 3 }
  0x8a   : > { %s1856_s25 = scalar_select %p1664_p6, 1, 0 }
  0x8b   : > { %p1156_p4 = scmp.lt.s32.totalorder %s1436_s10, 4  ;;  %s234_s30 = sand.u32 1, %s1436_s10  }
  0x8c   : > { %s236_s12 = sand.u32 1, %s1432_s9   ;;  %p1680_p13 = por %p162_p12, %p69_p2 }
  0x8d   : > { %s826_s28 = sshll.u32 %s236_s12, 3  ;;  %s827_s29 = sshll.u32 %s1436_s10, 7 }
  0x8e   : > { %s1859_s13 = scalar_select %p1680_p13, 1, 0 }
  0x8f   : > { %s1860_s2 = sld [smem:[#allocation22_spill]]  ;;  %s238_s21 = scalar_lea.vmem [#allocation8], %s826_s28 }
  0x90   : > { %s245_s22 = sshll.u32 %s238_s21, 4  ;;  %p1690_p0 = pnand %p1156_p4, %p65_p9  ;;  %s1694_s22 = int_to_ptr.vmem [resolvable:$true] %s245_s22 }
  0x91   : > { %s235_s23 = scalar_lea.sflag [#allocation9], %s234_s30 }
  0x92   : > { %p1328_p5 = pneg %p1690_p0 }
  0x95   : > { %s1688_s19 = scalar_lea.hbm %s1860_s2, %s827_s29  ;;  %s1331_s12 = scalar_lea.hbm %s1860_s2, 512 }
  0x96   : > { %s1326_s16 = scalar_lea.hbm %s1688_s19, 128  ;;  %p1332_p2 = scmp.lt.u32.totalorder %s1688_s19, %s1860_s2 }
  0x97   : > { %p1327_p1 = scmp.ne.s32.totalorder %s1688_s19, %s1326_s16  ;;  %p1333_p3 = scmp.lt.u32.totalorder %s1331_s12, %s1326_s16 }
  0x98   : > { %p1335_p8 = scmp.lt.u32.totalorder %s1326_s16, %s1688_s19 }
  0x99   : > { %p1329_p7 = pnand %p1328_p5, %p1327_p1  ;;  %p1334_p9 = por %p1333_p3, %p1332_p2 }
  0x9b   : > { %p1330_p11 = pneg %p1329_p7  ;;  %p1336_p12 = por %p1335_p8, %p1334_p9 }
  0x9d   : > { %p1337_p4 = pnand %p1336_p12, %p1330_p11 }
  0x9f   : > { %1340 = shalt.err (!%p1337_p4)
}
  0xa0   : > { %s1341_s30 = scalar_lea.vmem %s1694_s22, 128  ;;  %s1445_s14 = smov [#allocation8]  }
  0xa1   : > { %p1342_p1 = scmp.ne.s32.totalorder %s1694_s22, %s1341_s30  ;;  %s1346_s17 = sshll.u32 %s1445_s14, 4  ;;  %s1347_s17 = int_to_ptr.vmem [resolvable:$false] %s1346_s17 }
  0xa2   : > { %s1348_s21 = scalar_lea.vmem %s1347_s17, 256  ;;  %p1349_p6 = scmp.lt.s32.totalorder %s1694_s22, %s1347_s17 }
  0xa3   : > { %p1344_p7 = pnand %p1342_p1, %p1328_p5  ;;  %p1350_p2 = scmp.lt.s32.totalorder %s1348_s21, %s1341_s30 }
  0xa5   : > { %p1345_p13 = pneg %p1344_p7  ;;  %p1351_p3 = por %p1350_p2, %p1349_p6 }
  0xa7   : > { %p1352_p9 = pnand %p1351_p3, %p1345_p13 }
  0xa9   : > { %1355 = shalt.err (!%p1352_p9)
}
  0xaa   : > { %1147 = dma.hbm_to_vmem [thread:$0]  (!%p1690_p0), %s1688_s19, 128, %s1694_s22, %s235_s23  }
  0xab   : > { %p1862_p11 = scmp.ne.s32.totalorder %s1849_s11, 0 }
  0xac   : > { %p1863_p5 = scmp.eq.s32.totalorder (!%p1862_p11), %s1518_s0, 0 }
  0xad   : > { %254 = sbr.rel (%p1862_p11) target bundleno = 893 (0x37d), region = 40 }
  0xb4   : > { %1403 = dma.done.wait (%p1863_p5), [#allocation6], 1024   ;;  %p1864_p8 = pmov %p1863_p5 }
  0xb5   : > { %s260_s16 = sand.u32 1, %s1518_s0   ;;  %s1844_s24 = sand.u32 1, %s1428_s8  }
  0xb6   : > { %1405 = vsyncadd (%p1864_p8), [#allocation6], 4294966272  ;;  %s1731_s18 = sshll.u32 %s1844_s24, 3  ;;  %s261_s19 = scalar_lea.sflag [#allocation9], %s260_s16 }
  0xb7   : > { %s264_s22 = scalar_lea.vmem [#allocation8], %s1731_s18 }
  0xb8   : > { %1407 = dma.done.wait (%p1673_p10), %s261_s19, 128  }
  0xb9   : > { %1409 = vsyncadd (%p1673_p10), %s261_s19, 4294967168  ;;  %p1865_p6 = pmov %p1863_p5 }
  0xba   : > { %p1866_p13 = pmov %p1863_p5 }
  0xbb   : > { %1411 = dma.done.wait (%p1865_p6), [#allocation9], 2048  }
  0xbc   : > { %1413 = vsyncadd (%p1866_p13), [#allocation9], 4294965248  ;;  %p1867_p0 = pmov %p1863_p5 }
  0xbe   : > { %1415 = dma.done.wait (%p1867_p0), [#allocation12], 4096   ;;  %p1868_p12 = pmov %p1867_p0 }
  0xbf   : > { %v1446_v0 = vmov 0.0|0.0   ;;  %vm1447_vm0 = vmmov 0   ;;  %v1448_v1 = vmov 0.0   ;;  %v343_v2 = vld [vmem:[#allocation5] sm:$0xff]  ;;  %v344_v3 = vld [vmem:[#allocation5 + $0x8] sm:$0xff]  ;;  %v345_v4 = vld [vmem:[#allocation5 + $0x10] sm:$0xff] }
  0xc0   : > { %1417 = vsyncadd (%p1868_p12), [#allocation12], 4294963200  ;;  %1025 = vmatprep.subr.bf16.mxu0 %v1446_v0  ;;  %917 = vmatprep.mubr.msk.f32.mxu0 %vm1447_vm0, %v1448_v1  ;;  %v1026_v5 = vpack.c.bf16 %v344_v3, %v343_v2  ;;  %v346_v6 = vld [vmem:[#allocation5 + $0x18] sm:$0xff]  ;;  %v443_v8 = vld [vmem:[#allocation11] sm:$0xff]  ;;  %vm353_vm1 = vcmask 523264   ;;  %s835_s11 = sshll.u32 %s1518_s0, 3 }
  0xc1   : > { %1037 = vmatprep.subr.bf16.mxu1 %v1446_v0  ;;  %952 = vmatprep.mubr.msk.f32.mxu1 %vm1447_vm0, %v1448_v1  ;;  %v1029_v7 = vpack.c.bf16 %v346_v6, %v345_v4  ;;  %v444_v9 = vld [vmem:[#allocation11 + $0x8] sm:$0xff]  ;;  %v445_v10 = vld [vmem:[#allocation11 + $0x10] sm:$0xff]  ;;  %v348_v12 = vld [vmem:[#allocation5 + $0x28] sm:$0xff]  ;;  %s308_s20 = sadd.s32 1, %s835_s11  ;;  %s313_s23 = sadd.s32 2, %s835_s11 }
  0xc2   : > { %1027 = vmatpush3.bf16.msra.mxu0 %v1026_v5  ;;  %v347_v11 = vld [vmem:[#allocation5 + $0x20] sm:$0xff]  ;;  %v1038_v13 = vpack.c.bf16 %v444_v9, %v443_v8  ;;  %v446_v14 = vld [vmem:[#allocation11 + $0x18] sm:$0xff]  ;;  %v447_v17 = vld [vmem:[#allocation11 + $0x20] sm:$0xff]  ;;  %s304_s15 = sld [smem:[#allocation4 + %s835_s11]]  ;;  %s318_s29 = sadd.s32 3, %s835_s11 }
  0xc3   : > { %1028 = vmatprep.subr.bf16.mxu0 %v1446_v0  ;;  %v1041_v15 = vpack.c.bf16 %v446_v14, %v445_v10  ;;  %v1032_v16 = vpack.c.bf16 %v348_v12, %v347_v11  ;;  %v448_v18 = vld [vmem:[#allocation11 + $0x28] sm:$0xff]  ;;  %v349_v19 = vld [vmem:[#allocation5 + $0x30] sm:$0xff]  ;;  %v449_v23 = vld [vmem:[#allocation11 + $0x30] sm:$0xff]  ;;  %s309_s12 = sld [smem:[#allocation4 + %s308_s20]]  ;;  %s323_s14 = sadd.s32 4, %s835_s11 }
  0xc4   : > { %1039 = vmatpush3.bf16.msra.mxu1 %v1038_v13  ;;  %v350_v20 = vld [vmem:[#allocation5 + $0x38] sm:$0xff]  ;;  %v1044_v21 = vpack.c.bf16 %v448_v18, %v447_v17  ;;  %v450_v24 = vld [vmem:[#allocation11 + $0x38] sm:$0xff]  ;;  %v451_v27 = vld [vmem:[#allocation11 + $0x40] sm:$0xff]  ;;  %s314_s28 = sld [smem:[#allocation4 + %s313_s23]]  ;;  %s328_s21 = sadd.s32 5, %s835_s11 }
  0xc5   : > { %1040 = vmatprep.subr.bf16.mxu1 %v1446_v0  ;;  %v1035_v22 = vpack.c.bf16 %v350_v20, %v349_v19  ;;  %v1047_v25 = vpack.c.bf16 %v450_v24, %v449_v23  ;;  %v352_v26 = vld [vmem:[%s264_s22] sm:$0xff]  ;;  %v452_v28 = vld [vmem:[#allocation11 + $0x48] sm:$0xff]  ;;  %v455_v33 = vld [vmem:[#allocation11 + $0x60] sm:$0xff]  ;;  %s319_s30 = sld [smem:[#allocation4 + %s318_s29]]  ;;  %s333_s19 = sadd.s32 6, %s835_s11 }
  0xc6   : > { %1030 = vmatpush3.bf16.msra.mxu0 %v1029_v7  ;;  %v1050_v29 = vpack.c.bf16 %v452_v28, %v451_v27  ;;  %v453_v30 = vld [vmem:[#allocation11 + $0x50] sm:$0xff]  ;;  %v454_v31 = vld [vmem:[#allocation11 + $0x58] sm:$0xff]  ;;  %v456_v34 = vld [vmem:[#allocation11 + $0x68] sm:$0xff]  ;;  %s324_s17 = sld [smem:[#allocation4 + %s323_s14]]  ;;  %s338_s24 = sadd.s32 7, %s835_s11 }
  0xc7   : > { %1031 = vmatprep.subr.bf16.mxu0 %v1446_v0  ;;  %v1053_v32 = vpack.c.bf16 %v454_v31, %v453_v30  ;;  %v1056_v35 = vpack.c.bf16 %v456_v34, %v455_v33  ;;  %v457_v36 = vld [vmem:[#allocation11 + $0x70] sm:$0xff]  ;;  %v458_v37 = vld [vmem:[#allocation11 + $0x78] sm:$0xff]  ;;  %s329_s16 = sld [smem:[#allocation4 + %s328_s21]]  ;;  %v600_v47 = vld [vmem:[#allocation13] sm:$0xff]  ;;  %p1870_p4 = scmp.ne.s32.totalorder %s1856_s25, 0 }
  0xc8   : > { %1042 = vmatpush3.bf16.msra.mxu1 %v1041_v15  ;;  %v1059_v38 = vpack.c.bf16 %v458_v37, %v457_v36  ;;  %s334_s22 = sld [smem:[#allocation4 + %s333_s19]]  ;;  %s305_s1 = scalar_lea.vmem [#allocation5], %s304_s15  ;;  %v601_v48 = vld [vmem:[#allocation13 + $0x8] sm:$0xff]  ;;  %v602_v49 = vld [vmem:[#allocation13 + $0x10] sm:$0xff]  ;;  %v603_v51 = vld [vmem:[#allocation13 + $0x18] sm:$0xff] }
  0xc9   : > { %1043 = vmatprep.subr.bf16.mxu1 %v1446_v0  ;;  %v306_v39 = vld [vmem:[%s305_s1] sm:$0x1]  ;;  %s310_s2 = scalar_lea.vmem [#allocation5], %s309_s12  ;;  %s339_s3 = sld [smem:[#allocation4 + %s338_s24]]  ;;  %v1086_v50 = vpack.c.bf16 %v601_v48, %v600_v47  ;;  %v1089_v52 = vpack.c.bf16 %v603_v51, %v602_v49  ;;  %v604_v53 = vld [vmem:[#allocation13 + $0x20] sm:$0xff]  ;;  %v606_v56 = vld [vmem:[#allocation13 + $0x30] sm:$0xff] }
  0xca   : > { %1033 = vmatpush3.bf16.msra.mxu0 %v1032_v16  ;;  %v311_v40 = vld [vmem:[%s310_s2] sm:$0x1]  ;;  %307 = vst [vmem:[#allocation2] sm:$0x1] %v306_v39  ;;  %s315_s4 = scalar_lea.vmem [#allocation5], %s314_s28  ;;  %v607_v57 = vld [vmem:[#allocation13 + $0x38] sm:$0xff] }
  0xcb   : > { %1034 = vmatprep.subr.bf16.mxu0 %v1446_v0  ;;  %312 = vst [vmem:[#allocation2 + $0x1] sm:$0x1] %v311_v40  ;;  %v316_v41 = vld [vmem:[%s315_s4] sm:$0x1]  ;;  %s320_s20 = scalar_lea.vmem [#allocation5], %s319_s30  ;;  %v1095_v58 = vpack.c.bf16 %v607_v57, %v606_v56  ;;  %v608_v59 = vld [vmem:[#allocation13 + $0x40] sm:$0xff] }
  0xcc   : > { %1045 = vmatpush3.bf16.msra.mxu1 %v1044_v21  ;;  %317 = vst [vmem:[#allocation2 + $0x2] sm:$0x1] %v316_v41  ;;  %v321_v42 = vld [vmem:[%s320_s20] sm:$0x1]  ;;  %s325_s23 = scalar_lea.vmem [#allocation5], %s324_s17  ;;  %v610_v62 = vld [vmem:[#allocation13 + $0x50] sm:$0xff] }
  0xcd   : > { %1046 = vmatprep.subr.bf16.mxu1 %v1446_v0  ;;  %322 = vst [vmem:[#allocation2 + $0x3] sm:$0x1] %v321_v42  ;;  %v326_v43 = vld [vmem:[%s325_s23] sm:$0x1]  ;;  %s330_s29 = scalar_lea.vmem [#allocation5], %s329_s16  ;;  %v611_v63 = vld [vmem:[#allocation13 + $0x58] sm:$0xff] }
  0xce   : > { %1036 = vmatpush3.bf16.msra.mxu0 %v1035_v22  ;;  %327 = vst [vmem:[#allocation2 + $0x4] sm:$0x1] %v326_v43  ;;  %v331_v44 = vld [vmem:[%s330_s29] sm:$0x1]  ;;  %s335_s11 = scalar_lea.vmem [#allocation5], %s334_s22  ;;  %v1101_v2 = vpack.c.bf16 %v611_v63, %v610_v62  ;;  %v612_v3 = vld [vmem:[#allocation13 + $0x60] sm:$0xff] }
  0xcf   : > { %1085 = vmatprep.subr.bf16.mxu0 %v1446_v0  ;;  %332 = vst [vmem:[#allocation2 + $0x5] sm:$0x1] %v331_v44  ;;  %v336_v45 = vld [vmem:[%s335_s11] sm:$0x1]  ;;  %s340_s1 = scalar_lea.vmem [#allocation5], %s339_s3  ;;  %v427_v6 = vld [vmem:[#allocation10] sm:$0xff] }
  0xd0   : > { %1048 = vmatpush3.bf16.msra.mxu1 %v1047_v25  ;;  %337 = vst [vmem:[#allocation2 + $0x6] sm:$0x1] %v336_v45  ;;  %v341_v46 = vld [vmem:[%s340_s1] sm:$0x1]  ;;  %v429_v9 = vld [vmem:[#allocation10 + $0x10] sm:$0xff]  ;;  %v430_v10 = vld [vmem:[#allocation10 + $0x18] sm:$0xff] }
  0xd1   : > { %918 = vmatmul.mubr.msk.f32.vlgmr.msra.gmra.mrb[0].mxu0 %vm353_vm1, %v352_v26  ;;  %1049 = vmatprep.subr.bf16.mxu1 %v1446_v0  ;;  %342 = vst [vmem:[#allocation2 + $0x7] sm:$0x1] %v341_v46  ;;  %v605_v54 = vld [vmem:[#allocation13 + $0x28] sm:$0xff]  ;;  %v1065_v13 = vpack.c.bf16 %v430_v10, %v429_v9  ;;  %v431_v14 = vld [vmem:[#allocation10 + $0x20] sm:$0xff]  ;;  %v433_v17 = vld [vmem:[#allocation10 + $0x30] sm:$0xff]  ;;  %s302_s2 = scalar_lea.vmem [#allocation14], %s1731_s18 }
  0xd2   : > { %1022 = vmatprep.mubr.msk.f32.mxu0 %vm1447_vm0, %v1448_v1  ;;  %1087 = vmatpush3.bf16.msra.mxu0 %v1086_v50  ;;  %v1092_v55 = vpack.c.bf16 %v605_v54, %v604_v53  ;;  %v609_v60 = vld [vmem:[#allocation13 + $0x48] sm:$0xff]  ;;  %v434_v18 = vld [vmem:[#allocation10 + $0x38] sm:$0xff]  ;;  %v435_v20 = vld [vmem:[#allocation10 + $0x40] sm:$0xff]  ;;  %s701_s3 = sshll.u32 %s302_s2, 4  ;;  %s838_s4 = sshll.u32 %s1518_s0, 7  ;;  %s1787_s3 = int_to_ptr.vmem [resolvable:$true] %s701_s3 }
  0xd3   : > { %1088 = vmatprep.subr.bf16.mxu0 %v1446_v0  ;;  %v1098_v61 = vpack.c.bf16 %v609_v60, %v608_v59  ;;  %v613_v4 = vld [vmem:[#allocation13 + $0x68] sm:$0xff]  ;;  %v1071_v19 = vpack.c.bf16 %v434_v18, %v433_v17  ;;  %v438_v23 = vld [vmem:[#allocation10 + $0x58] sm:$0xff]  ;;  %v439_v25 = vld [vmem:[#allocation10 + $0x60] sm:$0xff]  ;;  %s1792_s12 = scalar_lea.hbm %s1840_s6, %s838_s4  ;;  %s1869_s28 = sand.u32 1, %s1428_s8  }
  0xd4   : > { %1051 = vmatpush3.bf16.msra.mxu1 %v1050_v29  ;;  %v1104_v5 = vpack.c.bf16 %v613_v4, %v612_v3  ;;  %v428_v7 = vld [vmem:[#allocation10 + $0x8] sm:$0xff]  ;;  %v441_v28 = vld [vmem:[#allocation10 + $0x70] sm:$0xff]  ;;  %v442_v29 = vld [vmem:[#allocation10 + $0x78] sm:$0xff]  ;;  %s688_s30 = scalar_lea.sflag [#allocation7], %s1869_s28  ;;  %s1356_s14 = scalar_lea.vmem %s1787_s3, 128 }
  0xd5   : > { %1052 = vmatprep.subr.bf16.mxu1 %v1446_v0  ;;  %v1062_v8 = vpack.c.bf16 %v428_v7, %v427_v6  ;;  %v432_v15 = vld [vmem:[#allocation10 + $0x28] sm:$0xff]  ;;  %v1083_v30 = vpack.c.bf16 %v442_v29, %v441_v28  ;;  %v615_v33 = vld [vmem:[#allocation13 + $0x78] sm:$0xff]  ;;  %p1357_p10 = scmp.ne.s32.totalorder %s1787_s3, %s1356_s14  ;;  %s1449_s0 = smov [#allocation14]  }
  0xd6   : > { %1090 = vmatpush3.bf16.msra.mxu0 %v1089_v52  ;;  %v1068_v16 = vpack.c.bf16 %v432_v15, %v431_v14  ;;  %v436_v21 = vld [vmem:[#allocation10 + $0x48] sm:$0xff]  ;;  %s1360_s18 = sshll.u32 %s1449_s0, 4  ;;  %s1361_s18 = int_to_ptr.vmem [resolvable:$false] %s1360_s18 }
  0xd7   : > { %1091 = vmatprep.subr.bf16.mxu0 %v1446_v0  ;;  %v1074_v22 = vpack.c.bf16 %v436_v21, %v435_v20  ;;  %v440_v26 = vld [vmem:[#allocation10 + $0x68] sm:$0xff]  ;;  %p1358_p1 = pnand %p1357_p10, %p1870_p4  ;;  %s1362_s17 = scalar_lea.vmem %s1361_s18, 256 }
  0xd8   : > { %1054 = vmatpush3.bf16.msra.mxu1 %v1053_v32  ;;  %v1080_v27 = vpack.c.bf16 %v440_v26, %v439_v25  ;;  %v351_v31 = vld [vmem:[#allocation2] sm:$0xff]  ;;  %v614_v32 = vld [vmem:[#allocation13 + $0x70] sm:$0xff]  ;;  %p1363_p2 = scmp.lt.s32.totalorder %s1787_s3, %s1361_s18  ;;  %p1364_p3 = scmp.lt.s32.totalorder %s1362_s17, %s1356_s14 }
  0xd9   : > { %1055 = vmatprep.subr.bf16.mxu1 %v1446_v0  ;;  %v1107_v34 = vpack.c.bf16 %v615_v33, %v614_v32  ;;  %p1359_p7 = pneg %p1358_p1 }
  0xda   : > { %1093 = vmatpush3.bf16.msra.mxu0 %v1092_v55  ;;  %p1365_p9 = por %p1364_p3, %p1363_p2 }
  0xdb   : > { %1094 = vmatprep.subr.bf16.mxu0 %v1446_v0 }
  0xdc   : > { %1057 = vmatpush3.bf16.msra.mxu1 %v1056_v35  ;;  %p1366_p11 = pnand %p1365_p9, %p1359_p7 }
  0xdd   : > { %1058 = vmatprep.subr.bf16.mxu1 %v1446_v0 }
  0xde   : > { %1096 = vmatpush3.bf16.msra.mxu0 %v1095_v58 }
  0xdf   : > { %1097 = vmatprep.subr.bf16.mxu0 %v1446_v0 }
  0xe0   : > { %1060 = vmatpush3.bf16.msra.mxu1 %v1059_v38 }
  0xe1   : > { %1061 = vmatprep.subr.bf16.mxu1 %v1446_v0 }
  0xe2   : > { %1099 = vmatpush3.bf16.msra.mxu0 %v1098_v61 }
  0xe3   : > { %1100 = vmatprep.subr.bf16.mxu0 %v1446_v0 }
  0xe6   : > { %1102 = vmatpush3.bf16.msra.mxu0 %v1101_v2 }
  0xe7   : > { %1103 = vmatprep.subr.bf16.mxu0 %v1446_v0 }
  0xea   : > { %1105 = vmatpush3.bf16.msra.mxu0 %v1104_v5 }
  0xeb   : > { %1106 = vmatprep.subr.bf16.mxu0 %v1446_v0 }
  0xee   : > { %1108 = vmatpush3.bf16.msra.mxu0 %v1107_v34 }
 0x1a4   : > { %v423_v11 = vpop.f32.mrb[0].mxu0 }
 0x1a5   : > { %v919_v12 = vpop.f32.mrb[1].mxu0  ;;  %953 = vmatmul.mubr.f32.vlgmr.msra.gmra.mrb[0].mxu1 %v423_v11 }
 0x1a6   : > { %1063 = vmatpush3.bf16.msra.mxu1 %v1062_v8  ;;  %987 = vmatprep.mubr.msk.f32.mxu1 %vm1447_vm0, %v1448_v1  ;;  %v437_v1 = vld [vmem:[#allocation10 + $0x50] sm:$0xff] }
 0x1a7   : > { %1064 = vmatprep.subr.bf16.mxu1 %v1446_v0  ;;  %v1077_v24 = vpack.c.bf16 %v438_v23, %v437_v1 }
 0x1aa   : > { %1066 = vmatpush3.bf16.msra.mxu1 %v1065_v13 }
 0x1ab   : > { %1067 = vmatprep.subr.bf16.mxu1 %v1446_v0 }
 0x1ae   : > { %1069 = vmatpush3.bf16.msra.mxu1 %v1068_v16 }
 0x1af   : > { %1070 = vmatprep.subr.bf16.mxu1 %v1446_v0 }
 0x1b2   : > { %1072 = vmatpush3.bf16.msra.mxu1 %v1071_v19 }
 0x1b3   : > { %1073 = vmatprep.subr.bf16.mxu1 %v1446_v0 }
 0x1b6   : > { %1075 = vmatpush3.bf16.msra.mxu1 %v1074_v22 }
 0x1b7   : > { %1076 = vmatprep.subr.bf16.mxu1 %v1446_v0 }
 0x1ba   : > { %1078 = vmatpush3.bf16.msra.mxu1 %v1077_v24 }
 0x1bb   : > { %1079 = vmatprep.subr.bf16.mxu1 %v1446_v0 }
 0x1be   : > { %1081 = vmatpush3.bf16.msra.mxu1 %v1080_v27 }
 0x1bf   : > { %1082 = vmatprep.subr.bf16.mxu1 %v1446_v0 }
 0x1c2   : > { %1084 = vmatpush3.bf16.msra.mxu1 %v1083_v30 }
 0x1c5   : > { %988 = vmatmul.mubr.f32.vlgmr.msra.gmra.mrb[0].mxu1 %v351_v31 }
 0x298   : > { %v595_v35 = vpop.f32.mrb[0].mxu1 }
 0x299   : > { %v599_v36 = vmax.f32 %v595_v35, 0.0  ;;  %v989_v37 = vpop.f32.mrb[1].mxu1 }
 0x29b   : > { %1023 = vmatmul.mubr.f32.vlgmr.msra.gmra.mrb[2].mxu0 %v599_v36 }
 0x36e   : > { %v682_v0 = vpop.f32.mrb[2].mxu0 }
 0x36f   : > { %686 = vst [vmem:[%s302_s2] sm:$0xff] %v682_v0  ;;  %v1024_v38 = vpop.f32.mrb[3].mxu0 }
 0x370   : > { %1369 = shalt.err (!%p1366_p11)
}
 0x371   : > { %s1370_s21 = scalar_lea.hbm %s1792_s12, 128  ;;  %s1374_s22 = scalar_lea.hbm %s1840_s6, 512 }
 0x372   : > { %p1371_p5 = scmp.ne.s32.totalorder %s1792_s12, %s1370_s21  ;;  %p1375_p13 = scmp.lt.u32.totalorder %s1792_s12, %s1840_s6 }
 0x373   : > { %p1376_p0 = scmp.lt.u32.totalorder %s1374_s22, %s1370_s21  ;;  %p1378_p10 = scmp.lt.u32.totalorder %s1370_s21, %s1792_s12 }
 0x374   : > { %p1372_p8 = pnand %p1371_p5, %p1870_p4 }
 0x375   : > { %p1377_p12 = por %p1376_p0, %p1375_p13 }
 0x376   : > { %p1373_p6 = pneg %p1372_p8 }
 0x377   : > { %p1379_p1 = por %p1378_p10, %p1377_p12 }
 0x379   : > { %p1380_p7 = pnand %p1379_p1, %p1373_p6 }
 0x37b   : > { %1383 = shalt.err (!%p1380_p7)
}
 0x37c   : > { %1129 = dma.vmem_to_hbm [thread:$0]  (%p1870_p4), %s1787_s3, 128, %s1792_s12, %s688_s30  }
 0x37d PF: > { %p1161_p2 = scmp.ge.s32.totalorder %s1436_s10, 2  ;;  %s713_s29 = sand.u32 1, %s1424_s7  }
 0x37e   : > { %p1871_p3 = scmp.ne.s32.totalorder %s1859_s13, 0  ;;  %s714_s11 = scalar_lea.sflag [#allocation7], %s713_s29 }
 0x380   : > { %p1149_p9 = pnand %p1161_p2, %p1871_p3 }
 0x382   : > { %1419 = dma.done.wait (!%p1149_p9), %s714_s11, 128  }
 0x383   : > { %1421 = vsyncadd (!%p1149_p9), %s714_s11, 4294967168  ;;  %p25_p11 = scmp.ge.s32.totalorder %s1652_s26, 6   ;;  %s1872_s7 = smov %s1428_s8 }
 0x384   : > { %s1873_s8 = smov %s1432_s9  ;;  %s1874_s9 = smov %s1669_s27 }
 0x385   : > { %s1875_s10 = smov %s1652_s26  ;;  %27 = sbr.rel (!%p25_p11) target bundleno = 20 (0x14), region = 110 }
 0x38c   :  { %719 = vsyncpa [#allocation6], 1 }
 0x38d   :  { %721 = vsyncpa [#allocation6 + $0x1], 1 }
 0x38e   :  { %722 = vsyncpa [#allocation9], 1 }
 0x38f   :  { %724 = vsyncpa [#allocation9 + $0x1], 1 }
 0x390   :  { %725 = vsyncpa [#allocation12], 1 }
 0x391   :  { %726 = vsyncpa [#allocation7], 1 }
 0x392   :  { %728 = vsyncpa [#allocation7 + $0x1], 1 }

</bundles_post_ra>
